<compile_context>
chip_gen: v7x
topology: tpu7x:2x2x1
jax: 0.10.0
libtpu: 0.0.40
codegen_flags: <defaults>
</compile_context>

<pallas_src>
import jax
import jax.numpy as jnp
from jax import lax
from jax.experimental import pallas as pl
from jax.experimental.pallas import tpu as pltpu


def _embed_gather_kernel(tok_ref, w_hbm, o_ref, copy_sem):
    # tok_ref:  (n_pad,) int32 in SMEM (scalar prefetch)
    # w_hbm:    (d_vocab, d_model) table ref left in HBM (no auto-DMA)
    # o_ref:    (token_block, d_model) VMEM output block -- rows DMA'd straight in
    # copy_sem: single shared DMA semaphore
    tb = o_ref.shape[0]
    base = pl.program_id(0) * tb

    def issue(j, carry):
        tok = tok_ref[base + j]
        pltpu.make_async_copy(
            w_hbm.at[pl.ds(tok, 1), :],
            o_ref.at[pl.ds(j, 1), :],
            copy_sem,
        ).start()
        return carry

    # Unrolled so the LLO scheduler can overlap SMEM id loads with DMA
    # descriptor pushes (the issue loop is scalar/misc-slot bound). tb is
    # always a multiple of 8, so unroll=8 divides the trip count exactly.
    lax.fori_loop(0, tb, issue, 0, unroll=8)

    # Single aggregate wait: every row copy signals the same DMA semaphore with
    # d_model*itemsize bytes, so one descriptor spanning (tb, d_model) bytes
    # (never started, only waited on) drains exactly tb row completions.
    # _pick_token_block guarantees tb <= d_vocab so the spanning source slice
    # is in bounds.
    pltpu.make_async_copy(
        w_hbm.at[pl.ds(0, tb), :],
        o_ref,
        copy_sem,
    ).wait()
    # TODO(synk): if an xprof trace shows exposed output writeback between grid
    # steps, sweep out_specs pipeline_mode=pl.Buffered(3).


def _round_up(x, m):
    return ((x + m - 1) // m) * m


def _sublane_pack(itemsize):
    # Rows per packed vreg tile: f32 -> 8, bf16 -> 16, int8/fp8 -> 32.
    return {4: 8, 2: 16, 1: 32}.get(int(itemsize), 8)


def _tpu_vmem_capacity_bytes():
    try:
        return int(pltpu.get_tpu_info().vmem_capacity_bytes)
    except Exception:
        return 64 * 1024 * 1024  # conservative fallback (v7x per-TC VMEM)


def _step_vmem_budget_bytes():
    # Per-step footprint is just the double-buffered output block now (no
    # gather scratch): ~48 MiB/step on 128-MiB parts (v5e/v6e), ~32 MiB on
    # v7x's 64 MiB per-TC VMEM.
    cap = _tpu_vmem_capacity_bytes()
    return min(cap // 2, 48 * 1024 * 1024)


def _pick_token_block(requested, n_tok, d_vocab, d_model, itemsize, budget):
    pack = _sublane_pack(itemsize)
    # Per-step VMEM ~= 2 (double-buffered) * token_block * d_model * itemsize.
    cap = max(pack, budget // (2 * d_model * itemsize))
    tb = min(int(requested), _round_up(n_tok, pack), int(cap))
    # Keep >= 2 grid steps when there is enough work so the "parallel" token
    # axis actually shards over both TensorCores on v7x (free on v5e/v6e).
    if n_tok > pack:
        tb = min(tb, _round_up(pl.cdiv(n_tok, 2), pack))
    # The aggregate-wait descriptor spans table rows [0, tb); keep tb <= d_vocab
    # (never a real constraint for realistic vocab sizes).
    tb = min(tb, max(pack, (d_vocab // pack) * pack))
    return max(pack, (tb // pack) * pack)


def embed_forward(tokens, w_vocab_dmodel, *, token_block=2048):
    """tokens: int[batch, pos]; w_vocab_dmodel: float[d_vocab, d_model]
    (the pre-transposed W_E). Returns float[batch, pos, d_model]."""
    batch, pos = tokens.shape
    d_vocab, d_model = w_vocab_dmodel.shape
    n_tok = batch * pos
    itemsize = jnp.dtype(w_vocab_dmodel.dtype).itemsize

    budget = _step_vmem_budget_bytes()
    tb = _pick_token_block(token_block, n_tok, d_vocab, d_model, itemsize, budget)
    n_pad = _round_up(n_tok, tb)

    # Glue: flatten + clamp ids (PyTorch raises on OOB; we clamp to keep the
    # HBM gather in bounds), pad to a whole number of blocks.
    tok_flat = jnp.clip(tokens.reshape(-1).astype(jnp.int32), 0, d_vocab - 1)
    if n_pad != n_tok:
        tok_flat = jnp.pad(tok_flat, (0, n_pad - n_tok))
    # TODO(synk): for very large batch*pos (>~256K tokens) the scalar-prefetched
    # id array exceeds SMEM; stage per-block id slices from HBM instead.

    out_flat = pl.pallas_call(
        _embed_gather_kernel,
        out_shape=jax.ShapeDtypeStruct((n_pad, d_model), w_vocab_dmodel.dtype),
        grid_spec=pltpu.PrefetchScalarGridSpec(
            num_scalar_prefetch=1,                    # token ids -> SMEM
            grid=(n_pad // tb,),
            in_specs=[
                pl.BlockSpec(memory_space=pl.ANY),    # full table stays in HBM
            ],
            out_specs=pl.BlockSpec((tb, d_model), lambda i, tok: (i, 0)),
            scratch_shapes=[
                pltpu.SemaphoreType.DMA(()),
            ],
        ),
        compiler_params=pltpu.CompilerParams(
            # Independent token blocks: shards across the 2 TensorCores on v7x.
            dimension_semantics=("parallel",),
            vmem_limit_bytes=int(budget + (16 << 20)),
        ),
    )(tok_flat, w_vocab_dmodel)

    return out_flat[:n_tok].reshape(batch, pos, d_model)


class Embed:
    """Pallas port of easy_transformer's Embed.  W_E: (d_model, d_vocab)."""

    def __init__(self, W_E):
        self.d_model, self.d_vocab = W_E.shape
        # One-time layout prep: (d_vocab, d_model) row-major so each token id
        # is one contiguous lane-dense row.  Done here (parameter init), never
        # in the forward path.
        self._w_vd = jnp.transpose(jnp.asarray(W_E))

    def __call__(self, tokens, *, token_block=2048):
        return embed_forward(tokens, self._w_vd, token_block=token_block)


if __name__ == "__main__":
    # small config consistent with the module
    batch, pos = 2, 8
    d_model, d_vocab = 32, 64

    key = jax.random.PRNGKey(0)
    k_w, k_tok, k_tok2 = jax.random.split(key, 3)
    # deterministic parameter init (module only declares the shape via torch.empty)
    W_E = jax.random.normal(k_w, (d_model, d_vocab), dtype=jnp.float32) * 0.02
    tokens = jax.random.randint(k_tok, (batch, pos), 0, d_vocab, dtype=jnp.int32)

    embed = Embed(W_E)  # table transposed once here, not per forward call

    # pure-JAX reference of the PyTorch semantics
    ref = jnp.transpose(W_E[:, tokens], (1, 2, 0))  # (d_model,b,p) -> (b,p,d_model)
    out = jax.block_until_ready(embed(tokens))
    assert out.shape == (batch, pos, d_model)
    assert jnp.array_equal(out, ref), "mismatch vs reference (f32, 2-step grid)"

    # ragged token count -> exercises block padding + final slice
    tokens2 = jax.random.randint(k_tok2, (3, 5), 0, d_vocab, dtype=jnp.int32)
    ref2 = jnp.transpose(W_E[:, tokens2], (1, 2, 0))
    out2 = jax.block_until_ready(embed(tokens2))
    assert jnp.array_equal(out2, ref2), "mismatch vs reference (f32, padded block)"

    # bf16 table -> exercises the 16-row sublane pack and a single-step grid
    embed_bf16 = Embed(W_E.astype(jnp.bfloat16))
    ref_bf16 = jnp.transpose(W_E.astype(jnp.bfloat16)[:, tokens], (1, 2, 0))
    out_bf16 = jax.block_until_ready(embed_bf16(tokens))
    assert jnp.array_equal(out_bf16, ref_bf16), "mismatch vs reference (bf16)"

    print("KERNEL_OK")
</pallas_src>

<mosaic_0001>
module attributes {stable_mosaic.version = 11 : i64} {
  func.func @_embed_gather_kernel(%arg0: i32, %arg1: memref<16xi32, #tpu.memory_space<smem>>, %arg2: memref<64x32xf32, #tpu.memory_space<any>>, %arg3: memref<8x32xf32, #tpu.memory_space<vmem>>, %arg4: memref<!tpu.dma_semaphore, #tpu.memory_space<semaphore_mem>>) attributes {dimension_semantics = [#tpu.dimension_semantics<parallel>], iteration_bounds = array<i64: 2>, scalar_prefetch = 1 : i64, scratch_operands = 1 : i64, tpu.core_type = #tpu.core_type<tc>, window_params = [{}, {transform_indices = @transform_1, window_bounds = array<i64: 8, 32>}]} {
    %c8_i32 = arith.constant 8 : i32
    %0 = arith.muli %arg0, %c8_i32 : i32
    %c0_i32 = arith.constant 0 : i32
    %1 = arith.addi %0, %c0_i32 : i32
    %2 = arith.index_cast %1 : i32 to index
    %3 = memref.load %arg1[%2] : memref<16xi32, #tpu.memory_space<smem>>
    %c0_i32_0 = arith.constant 0 : i32
    %4 = tpu.memref_slice %arg2[%3, %c0_i32_0] : memref<64x32xf32, #tpu.memory_space<any>> -> memref<1x32xf32, #tpu.memory_space<any>>
    %c0_i32_1 = arith.constant 0 : i32
    %5 = tpu.memref_slice %arg3[%c0_i32, %c0_i32_1] : memref<8x32xf32, #tpu.memory_space<vmem>> -> memref<1x32xf32, #tpu.memory_space<vmem>>
    tpu.enqueue_dma source(%4 : memref<1x32xf32, #tpu.memory_space<any>>) target(%5 : memref<1x32xf32, #tpu.memory_space<vmem>>) target_semaphore(%arg4 : memref<!tpu.dma_semaphore, #tpu.memory_space<semaphore_mem>>)
    %c1_i32 = arith.constant 1 : i32
    %6 = arith.addi %0, %c1_i32 : i32
    %7 = arith.index_cast %6 : i32 to index
    %8 = memref.load %arg1[%7] : memref<16xi32, #tpu.memory_space<smem>>
    %c0_i32_2 = arith.constant 0 : i32
    %9 = tpu.memref_slice %arg2[%8, %c0_i32_2] : memref<64x32xf32, #tpu.memory_space<any>> -> memref<1x32xf32, #tpu.memory_space<any>>
    %c0_i32_3 = arith.constant 0 : i32
    %10 = tpu.memref_slice %arg3[%c1_i32, %c0_i32_3] : memref<8x32xf32, #tpu.memory_space<vmem>> -> memref<1x32xf32, #tpu.memory_space<vmem>>
    tpu.enqueue_dma source(%9 : memref<1x32xf32, #tpu.memory_space<any>>) target(%10 : memref<1x32xf32, #tpu.memory_space<vmem>>) target_semaphore(%arg4 : memref<!tpu.dma_semaphore, #tpu.memory_space<semaphore_mem>>)
    %c2_i32 = arith.constant 2 : i32
    %11 = arith.addi %0, %c2_i32 : i32
    %12 = arith.index_cast %11 : i32 to index
    %13 = memref.load %arg1[%12] : memref<16xi32, #tpu.memory_space<smem>>
    %c0_i32_4 = arith.constant 0 : i32
    %14 = tpu.memref_slice %arg2[%13, %c0_i32_4] : memref<64x32xf32, #tpu.memory_space<any>> -> memref<1x32xf32, #tpu.memory_space<any>>
    %c0_i32_5 = arith.constant 0 : i32
    %15 = tpu.memref_slice %arg3[%c2_i32, %c0_i32_5] : memref<8x32xf32, #tpu.memory_space<vmem>> -> memref<1x32xf32, #tpu.memory_space<vmem>>
    tpu.enqueue_dma source(%14 : memref<1x32xf32, #tpu.memory_space<any>>) target(%15 : memref<1x32xf32, #tpu.memory_space<vmem>>) target_semaphore(%arg4 : memref<!tpu.dma_semaphore, #tpu.memory_space<semaphore_mem>>)
    %c3_i32 = arith.constant 3 : i32
    %16 = arith.addi %0, %c3_i32 : i32
    %17 = arith.index_cast %16 : i32 to index
    %18 = memref.load %arg1[%17] : memref<16xi32, #tpu.memory_space<smem>>
    %c0_i32_6 = arith.constant 0 : i32
    %19 = tpu.memref_slice %arg2[%18, %c0_i32_6] : memref<64x32xf32, #tpu.memory_space<any>> -> memref<1x32xf32, #tpu.memory_space<any>>
    %c0_i32_7 = arith.constant 0 : i32
    %20 = tpu.memref_slice %arg3[%c3_i32, %c0_i32_7] : memref<8x32xf32, #tpu.memory_space<vmem>> -> memref<1x32xf32, #tpu.memory_space<vmem>>
    tpu.enqueue_dma source(%19 : memref<1x32xf32, #tpu.memory_space<any>>) target(%20 : memref<1x32xf32, #tpu.memory_space<vmem>>) target_semaphore(%arg4 : memref<!tpu.dma_semaphore, #tpu.memory_space<semaphore_mem>>)
    %c4_i32 = arith.constant 4 : i32
    %21 = arith.addi %0, %c4_i32 : i32
    %22 = arith.index_cast %21 : i32 to index
    %23 = memref.load %arg1[%22] : memref<16xi32, #tpu.memory_space<smem>>
    %c0_i32_8 = arith.constant 0 : i32
    %24 = tpu.memref_slice %arg2[%23, %c0_i32_8] : memref<64x32xf32, #tpu.memory_space<any>> -> memref<1x32xf32, #tpu.memory_space<any>>
    %c0_i32_9 = arith.constant 0 : i32
    %25 = tpu.memref_slice %arg3[%c4_i32, %c0_i32_9] : memref<8x32xf32, #tpu.memory_space<vmem>> -> memref<1x32xf32, #tpu.memory_space<vmem>>
    tpu.enqueue_dma source(%24 : memref<1x32xf32, #tpu.memory_space<any>>) target(%25 : memref<1x32xf32, #tpu.memory_space<vmem>>) target_semaphore(%arg4 : memref<!tpu.dma_semaphore, #tpu.memory_space<semaphore_mem>>)
    %c5_i32 = arith.constant 5 : i32
    %26 = arith.addi %0, %c5_i32 : i32
    %27 = arith.index_cast %26 : i32 to index
    %28 = memref.load %arg1[%27] : memref<16xi32, #tpu.memory_space<smem>>
    %c0_i32_10 = arith.constant 0 : i32
    %29 = tpu.memref_slice %arg2[%28, %c0_i32_10] : memref<64x32xf32, #tpu.memory_space<any>> -> memref<1x32xf32, #tpu.memory_space<any>>
    %c0_i32_11 = arith.constant 0 : i32
    %30 = tpu.memref_slice %arg3[%c5_i32, %c0_i32_11] : memref<8x32xf32, #tpu.memory_space<vmem>> -> memref<1x32xf32, #tpu.memory_space<vmem>>
    tpu.enqueue_dma source(%29 : memref<1x32xf32, #tpu.memory_space<any>>) target(%30 : memref<1x32xf32, #tpu.memory_space<vmem>>) target_semaphore(%arg4 : memref<!tpu.dma_semaphore, #tpu.memory_space<semaphore_mem>>)
    %c6_i32 = arith.constant 6 : i32
    %31 = arith.addi %0, %c6_i32 : i32
    %32 = arith.index_cast %31 : i32 to index
    %33 = memref.load %arg1[%32] : memref<16xi32, #tpu.memory_space<smem>>
    %c0_i32_12 = arith.constant 0 : i32
    %34 = tpu.memref_slice %arg2[%33, %c0_i32_12] : memref<64x32xf32, #tpu.memory_space<any>> -> memref<1x32xf32, #tpu.memory_space<any>>
    %c0_i32_13 = arith.constant 0 : i32
    %35 = tpu.memref_slice %arg3[%c6_i32, %c0_i32_13] : memref<8x32xf32, #tpu.memory_space<vmem>> -> memref<1x32xf32, #tpu.memory_space<vmem>>
    tpu.enqueue_dma source(%34 : memref<1x32xf32, #tpu.memory_space<any>>) target(%35 : memref<1x32xf32, #tpu.memory_space<vmem>>) target_semaphore(%arg4 : memref<!tpu.dma_semaphore, #tpu.memory_space<semaphore_mem>>)
    %c7_i32 = arith.constant 7 : i32
    %36 = arith.addi %0, %c7_i32 : i32
    %37 = arith.index_cast %36 : i32 to index
    %38 = memref.load %arg1[%37] : memref<16xi32, #tpu.memory_space<smem>>
    %c0_i32_14 = arith.constant 0 : i32
    %39 = tpu.memref_slice %arg2[%38, %c0_i32_14] : memref<64x32xf32, #tpu.memory_space<any>> -> memref<1x32xf32, #tpu.memory_space<any>>
    %c0_i32_15 = arith.constant 0 : i32
    %40 = tpu.memref_slice %arg3[%c7_i32, %c0_i32_15] : memref<8x32xf32, #tpu.memory_space<vmem>> -> memref<1x32xf32, #tpu.memory_space<vmem>>
    tpu.enqueue_dma source(%39 : memref<1x32xf32, #tpu.memory_space<any>>) target(%40 : memref<1x32xf32, #tpu.memory_space<vmem>>) target_semaphore(%arg4 : memref<!tpu.dma_semaphore, #tpu.memory_space<semaphore_mem>>)
    %c8_i32_16 = arith.constant 8 : i32
    %c0_i32_17 = arith.constant 0 : i32
    %c0_i32_18 = arith.constant 0 : i32
    %41 = tpu.memref_slice %arg2[%c0_i32_17, %c0_i32_18] : memref<64x32xf32, #tpu.memory_space<any>> -> memref<8x32xf32, #tpu.memory_space<any>>
    tpu.wait_dma2 semaphore(%arg4 : memref<!tpu.dma_semaphore, #tpu.memory_space<semaphore_mem>>) src(%41 : memref<8x32xf32, #tpu.memory_space<any>>) dst(%arg3 : memref<8x32xf32, #tpu.memory_space<vmem>>)
    return
  }
  func.func @transform_1(%arg0: i32, %arg1: memref<16xi32, #tpu.memory_space<smem>>) -> (i32, i32) {
    %c0_i32 = arith.constant 0 : i32
    %c0_i32_0 = arith.constant 0 : i32
    return %arg0, %c0_i32 : i32, i32
  }
}

</mosaic_0001>

<bundles_post_ra>
// kernel: tpu_custom_call.1
= control target key start
LH: loop header
LB: loop body
LE: loop exit
PB: predicated region body
PF: predicated region fallthrough
CT: control target
= control target key end

     0   :  { %s871_s0 = inlined_call_operand.vmem [shape: s32[16], index: 0, kind: input, shape index: {}]   ;;  %s872_s1 = inlined_call_operand.vmem [shape: f32[64,32], index: 1, kind: input, shape index: {}]   ;;  %s873_s2 = inlined_call_operand.hbm [shape: f32[16,32], index: 2, kind: output, shape index: {}]  }
   0x1   :  { %s7_s11 = sshll.u32 %s871_s0, 4  ;;  %s8_s11 = int_to_ptr.vmem [resolvable:$true] %s7_s11 }
   0x2   :  { %s654_s12 = scalar_lea.vmem %s8_s11, 16  ;;  %p659_p1 = scmp.lt.s32.totalorder %s8_s11, %s8_s11 }
   0x3   :  { %p655_p0 = scmp.ne.s32.totalorder %s8_s11, %s654_s12  ;;  %p660_p2 = scmp.lt.s32.totalorder %s654_s12, %s654_s12 }
   0x5   :  { %p661_p3 = por %p660_p2, %p659_p1 }
   0x7   :  { %p662_p4 = pnand %p661_p3, %p655_p0 }
   0x9   :  { %665 = shalt.err (!%p662_p4)  }
   0xa   :  { %s726_s13 = smov [#allocation4]  }
   0xb   :  { %10 = dma.vmem_to_smem %s8_s11, 16, %s726_s13, [#allocation3] }
   0xc   :  { %706 = dma.done.wait [#allocation3], 16 }
   0xd   :  { %707 = vsyncadd [#allocation3], 4294967280 }
   0xe   :  { %12 = sfence }
   0xf   :  { %13 = vsyncpa [#allocation6], 0 }
  0x10   :  { %15 = vsyncpa [#allocation6 + $0x1], 0  ;;  %s746_s14 = smov 0   ;;  %s748_s15 = smov 0  }
  0x11   :  { %s750_s0 = smov 0  }
  0x12 LB: > { %s598_s16 = sadd.s32 4294967295, %s724_s0   ;;  %s763_s17 = sadd.s32 1, %s724_s0   ;;  %s724_s0 = sphi %s750_s0, %s878_s0   ;;  %s720_s15 = sphi %s748_s15, %s877_s15   ;;  %s716_s14 = sphi %s746_s14, %s876_s14  }
  0x13   : > { %s24_s18 = ssub.s32 %s724_s0, %s763_s17  ;;  %s27_s19 = sadd.s32 1, %s720_s15 }
  0x14   : > { %p25_p5 = scmp.eq.s32.totalorder %s24_s18, 0  ;;  %p599_p6 = scmp.ne.s32.totalorder %s24_s18, 0 }
  0x15   : > { %p31_p7 = scmp.eq.s32.totalorder %s724_s0, 1  ;;  %p36_p8 = scmp.ne.s32.totalorder %s720_s15, %s716_s14 }
  0x16   : > { %s772_s20 = scalar_select %p25_p5, %s720_s15, %s27_s19  }
  0x17   : > { %p774_p9 = por %p599_p6, %p31_p7  ;;  %p37_p10 = scmp.eq.s32.totalorder %s598_s16, 1 }
  0x18   : > { %p600_p12 = scmp.ge.s32.totalorder %s724_s0, 2 }
  0x19   : > { %p778_p11 = por %p37_p10, %p36_p8  ;;  %s51_s23 = sand.u32 (!%p600_p12), 1, %s720_s15  }
  0x1a   : > { %46 = sbr.rel (%p600_p12) target bundleno = 132 (0x84), region = 12  ;;  %s785_s24 = sshll.u32 (!%p600_p12), %s724_s0, 3 }
  0x1b   : > { %s55_s25 = sld [smem:[#allocation4 + %s785_s24]] (!%p600_p12)  ;;  %s601_s26 = sshll.u32 (!%p600_p12), %s51_s23, 3 }
  0x1c   : > { %s793_s30 = scalar_lea.vmem (!%p600_p12), [#allocation5], %s601_s26 }
  0x21   : > { %s56_s29 = scalar_lea.vmem %s872_s1, %s55_s25 }
  0x22   : > { %v74_v0 = vld [vmem:[%s56_s29] sm:$0x1] }
  0x23   : > { %75 = vst [vmem:[%s793_s30] sm:$0x1] %v74_v0 }
  0x24   : > { %100 = vsyncadd [#allocation2], 16  ;;  %s101_s3 = sadd.s32 1, %s785_s24 }
  0x25   : > { %s102_s4 = sld [smem:[#allocation4 + %s101_s3]] }
  0x2b   : > { %s103_s7 = scalar_lea.vmem %s872_s1, %s102_s4 }
  0x2c   : > { %v122_v1 = vld [vmem:[%s103_s7] sm:$0x1] }
  0x2d   : > { %604 = vst [vmem:[%s793_s30 + $0x1] sm:$0x1] %v122_v1 }
  0x2e   : > { %148 = vsyncadd [#allocation2], 16  ;;  %s149_s8 = sadd.s32 2, %s785_s24 }
  0x2f   : > { %s150_s9 = sld [smem:[#allocation4 + %s149_s8]] }
  0x35   : > { %s151_s12 = scalar_lea.vmem %s872_s1, %s150_s9 }
  0x36   : > { %v170_v2 = vld [vmem:[%s151_s12] sm:$0x1] }
  0x37   : > { %606 = vst [vmem:[%s793_s30 + $0x2] sm:$0x1] %v170_v2 }
  0x38   : > { %196 = vsyncadd [#allocation2], 16  ;;  %s197_s13 = sadd.s32 3, %s785_s24 }
  0x39   : > { %s198_s16 = sld [smem:[#allocation4 + %s197_s13]] }
  0x3f   : > { %s199_s25 = scalar_lea.vmem %s872_s1, %s198_s16 }
  0x40   : > { %v218_v3 = vld [vmem:[%s199_s25] sm:$0x1] }
  0x41   : > { %608 = vst [vmem:[%s793_s30 + $0x3] sm:$0x1] %v218_v3 }
  0x42   : > { %244 = vsyncadd [#allocation2], 16  ;;  %s245_s26 = sadd.s32 4, %s785_s24 }
  0x43   : > { %s246_s27 = sld [smem:[#allocation4 + %s245_s26]] }
  0x49   : > { %s247_s3 = scalar_lea.vmem %s872_s1, %s246_s27 }
  0x4a   : > { %v266_v4 = vld [vmem:[%s247_s3] sm:$0x1] }
  0x4b   : > { %610 = vst [vmem:[%s793_s30 + $0x4] sm:$0x1] %v266_v4 }
  0x4c   : > { %292 = vsyncadd [#allocation2], 16  ;;  %s293_s4 = sadd.s32 5, %s785_s24 }
  0x4d   : > { %s294_s5 = sld [smem:[#allocation4 + %s293_s4]] }
  0x53   : > { %s295_s8 = scalar_lea.vmem %s872_s1, %s294_s5 }
  0x54   : > { %v314_v5 = vld [vmem:[%s295_s8] sm:$0x1] }
  0x55   : > { %612 = vst [vmem:[%s793_s30 + $0x5] sm:$0x1] %v314_v5 }
  0x56   : > { %340 = vsyncadd [#allocation2], 16  ;;  %s341_s9 = sadd.s32 6, %s785_s24 }
  0x57   : > { %s342_s10 = sld [smem:[#allocation4 + %s341_s9]] }
  0x5d   : > { %s343_s13 = scalar_lea.vmem %s872_s1, %s342_s10 }
  0x5e   : > { %v362_v6 = vld [vmem:[%s343_s13] sm:$0x1] }
  0x5f   : > { %614 = vst [vmem:[%s793_s30 + $0x6] sm:$0x1] %v362_v6 }
  0x60   : > { %388 = vsyncadd [#allocation2], 16  ;;  %s389_s16 = sadd.s32 7, %s785_s24 }
  0x61   : > { %s390_s18 = sld [smem:[#allocation4 + %s389_s16]] }
  0x67   : > { %s391_s26 = scalar_lea.vmem %s872_s1, %s390_s18 }
  0x68   : > { %v410_v7 = vld [vmem:[%s391_s26] sm:$0x1] }
  0x69   : > { %616 = vst [vmem:[%s793_s30 + $0x7] sm:$0x1] %v410_v7 }
  0x6a   : > { %436 = vsyncadd [#allocation2], 16 }
  0x6b   : > { %708 = dma.done.wait [#allocation2], 128 }
  0x6c   : > { %709 = vsyncadd [#allocation2], 4294967168  ;;  %s618_s27 = sshll.u32 %s724_s0, 7  ;;  %s454_s24 = sshll.u32 %s793_s30, 4  ;;  %s455_s24 = int_to_ptr.vmem [resolvable:$true] %s454_s24 }
  0x6d   : > { %s835_s3 = scalar_lea.hbm %s873_s2, %s618_s27  ;;  %s441_s4 = scalar_lea.sflag [#allocation6], %s51_s23 }
  0x6e   : > { %s666_s5 = scalar_lea.vmem %s455_s24, 128  ;;  %s727_s6 = smov [#allocation5]  }
  0x6f   : > { %p667_p13 = scmp.ne.s32.totalorder %s455_s24, %s666_s5  ;;  %s670_s7 = sshll.u32 %s727_s6, 4  ;;  %s671_s7 = int_to_ptr.vmem [resolvable:$false] %s670_s7 }
  0x70   : > { %s672_s8 = scalar_lea.vmem %s671_s7, 256  ;;  %p673_p2 = scmp.lt.s32.totalorder %s455_s24, %s671_s7 }
  0x71   : > { %p668_p0 = pnand %p667_p13, %p774_p9  ;;  %p674_p3 = scmp.lt.s32.totalorder %s672_s8, %s666_s5 }
  0x73   : > { %p669_p1 = pneg %p668_p0  ;;  %p675_p4 = por %p674_p3, %p673_p2 }
  0x75   : > { %p676_p5 = pnand %p675_p4, %p669_p1 }
  0x77   : > { %679 = shalt.err (!%p676_p5)
}
  0x78   : > { %s680_s23 = scalar_lea.hbm %s835_s3, 128  ;;  %s684_s10 = scalar_lea.hbm %s873_s2, 256 }
  0x79   : > { %p681_p6 = scmp.ne.s32.totalorder %s835_s3, %s680_s23  ;;  %p685_p10 = scmp.lt.u32.totalorder %s835_s3, %s873_s2 }
  0x7a   : > { %p686_p12 = scmp.lt.u32.totalorder %s684_s10, %s680_s23  ;;  %p688_p0 = scmp.lt.u32.totalorder %s680_s23, %s835_s3 }
  0x7b   : > { %p682_p7 = pnand %p681_p6, %p774_p9 }
  0x7c   : > { %p687_p13 = por %p686_p12, %p685_p10 }
  0x7d   : > { %p683_p8 = pneg %p682_p7 }
  0x7e   : > { %p689_p1 = por %p688_p0, %p687_p13 }
  0x80   : > { %p690_p2 = pnand %p689_p1, %p683_p8 }
  0x82   : > { %693 = shalt.err (!%p690_p2)
}
  0x83   : > { %622 = dma.vmem_to_hbm [thread:$0]  (%p774_p9), %s455_s24, 128, %s835_s3, %s441_s4  }
  0x84 PF: > { %p628_p3 = scmp.ge.s32.totalorder %s724_s0, 1  ;;  %s466_s13 = sand.u32 1, %s716_s14  }
  0x85   : > { %s467_s16 = scalar_lea.sflag [#allocation6], %s466_s13 }
  0x86   : > { %p625_p4 = pnand %p628_p3, %p778_p11 }
  0x88   : > { %711 = dma.done.wait (!%p625_p4), %s467_s16, 128  }
  0x89   : > { %713 = vsyncadd (!%p625_p4), %s467_s16, 4294967168  ;;  %p18_p5 = scmp.ge.s32.totalorder %s763_s17, 3   ;;  %s876_s14 = smov %s720_s15 }
  0x8a   : > { %s877_s15 = smov %s772_s20  ;;  %s878_s0 = smov %s763_s17 }
  0x8b   :  { %20 = sbr.rel (!%p18_p5) target bundleno = 18 (0x12), region = 379 }
  0x92   :  { %472 = vsyncpa [#allocation6], 1 }
  0x93   :  { %474 = vsyncpa [#allocation6 + $0x1], 1 }
  0x94   :  { %475 = vsyncmov [#allocation2] }
  0x97   :  { %s476_s0 = vpop.sfrf %475 }
  0x98   :  { %p621_p9 = scmp.ne.s32.totalorder %s476_s0, 0 }
  0x9a   :  { %480 = shalt.err (%p621_p9)  }

</bundles_post_ra>
